<compile_context>
chip_gen: v7x
topology: tpu7x:2x2x1
jax: 0.10.0
libtpu: 0.0.40
codegen_flags: <defaults>
</compile_context>

<pallas_src>
import jax
import jax.numpy as jnp
from jax import lax
from jax.experimental import pallas as pl
from jax.experimental.pallas import tpu as pltpu

HIDDEN_DIM = 64
INPUT_DIM = 300
Y_DIM = 1


def _round_up(n, m):
    return ((n + m - 1) // m) * m


def _make_kernel(compute_dtype):
    def kernel(y_ref, x_ref, w1_ref, b1_ref, w2_ref, b2_ref, wo_ref, bo_ref,
               z_ref, ld_ref):
        """One batch tile: fused 3-layer MLP + flow transform (lane-major tail)."""
        # x streamed in its stored dtype; cast to compute dtype for the MXU.
        x = x_ref[...].astype(compute_dtype)                        # (tb, input_dim)

        # Linear(input_dim, hidden) + ReLU  (Dropout == identity in eval mode)
        h1 = jnp.dot(x, w1_ref[...],
                     preferred_element_type=jnp.float32) + b1_ref[...]
        h1 = jnp.maximum(h1, 0.0).astype(compute_dtype)             # (tb, hidden)

        # Linear(hidden, hidden) + ReLU
        h2 = jnp.dot(h1, w2_ref[...],
                     preferred_element_type=jnp.float32) + b2_ref[...]
        h2 = jnp.maximum(h2, 0.0).astype(compute_dtype)             # (tb, hidden)

        # Fused final projection, transposed: (2, hidden) x (tb, hidden)^T
        # -> (2, tb) with the batch in lanes.  Row 0 = mu, row 1 = log_sigma.
        p = lax.dot_general(wo_ref[...], h2,
                            dimension_numbers=(((1,), (1,)), ((), ())),
                            preferred_element_type=jnp.float32)     # (2, tb)
        p = p + bo_ref[...]                                         # + (2, 1) bias
        mu = p[0:1, :]                                              # (1, tb)
        log_sigma = p[1:2, :]                                       # (1, tb)

        y = y_ref[0]                                                # (1, tb) f32
        # (y - mu) / sigma == (y - mu) * exp(-log_sigma)   (no VPU divide)
        z = jnp.tanh((y - mu) * jnp.exp(-log_sigma))
        z_ref[0] = z
        # y_dim == 1, so the sums over the last dim are the single column.
        ld_ref[0] = -log_sigma + jnp.log(1.0 - z * z + 1e-6)

    return kernel


def nonlinear_flow_forward(y, x, params, *, tile_b=4096,
                           compute_dtype=jnp.bfloat16):
    """params = (w1, b1, w2, b2, w3, b3) with W as (in, out), b as (1, out).

    Returns (z: (B, 1) f32, log_det: (B,) f32).
    """
    w1, b1, w2, b2, w3, b3 = params
    B = x.shape[0]
    x2 = x.reshape(B, -1)                     # stored dtype; cast happens in-kernel
    input_dim = x2.shape[1]
    hidden = w1.shape[1]

    # Batch tile: multiple of 128 (lane-dense outputs, bf16 sublane packing),
    # capped so the grid keeps >= 2 steps when possible (v7x: 2 TensorCores).
    tb = _round_up(max(128, min(int(tile_b), B)), 128)
    if B > 128 and pl.cdiv(B, tb) < 2:
        tb = _round_up(pl.cdiv(B, 2), 128)
    n_tiles = pl.cdiv(B, tb)
    b_pad = n_tiles * tb

    # y is tiny -> always pad + reshape to lane-major (n_tiles, 1, tb).
    y2 = jnp.pad(y.reshape(-1).astype(jnp.float32), (0, b_pad - B))
    y2 = y2.reshape(n_tiles, 1, tb)

    # x is the heavy operand: only pad when B is not a multiple of the tile
    # (costs one extra HBM pass; prefer batch sizes that are multiples of 128).
    if b_pad != B:
        x2 = jnp.pad(x2, ((0, b_pad - B), (0, 0)))

    # Small parameters: cast once in the wrapper (negligible traffic).
    w1c = w1.astype(compute_dtype)
    w2c = w2.astype(compute_dtype)
    w_out = w3.T.astype(compute_dtype)                 # (2, hidden) row0=mu row1=ls
    b1c = b1.reshape(1, hidden).astype(jnp.float32)
    b2c = b2.reshape(1, hidden).astype(jnp.float32)
    b_out = b3.reshape(1, 2 * Y_DIM).T.astype(jnp.float32)   # (2, 1)

    x_spec = pl.BlockSpec((tb, input_dim), lambda i: (i, 0))
    lane_spec = pl.BlockSpec((1, 1, tb), lambda i: (i, 0, 0))

    def const2d(shape):
        return pl.BlockSpec(shape, lambda i: (0, 0))

    z, ld = pl.pallas_call(
        _make_kernel(compute_dtype),
        out_shape=(
            jax.ShapeDtypeStruct((n_tiles, 1, tb), jnp.float32),   # z
            jax.ShapeDtypeStruct((n_tiles, 1, tb), jnp.float32),   # log_det
        ),
        grid=(n_tiles,),
        in_specs=[
            lane_spec,                              # y (lane-major)
            x_spec,                                 # x (streamed, double-buffered)
            const2d((input_dim, hidden)),           # w1 (VMEM-resident)
            const2d((1, hidden)),                   # b1
            const2d((hidden, hidden)),              # w2
            const2d((1, hidden)),                   # b2
            const2d((2 * Y_DIM, hidden)),           # w_out (fused mu/log_sigma)
            const2d((2 * Y_DIM, 1)),                # b_out
        ],
        out_specs=(lane_spec, lane_spec),
        compiler_params=pltpu.CompilerParams(
            dimension_semantics=("parallel",),
            vmem_limit_bytes=48 * 1024 * 1024,      # fits v7x's 64 MiB VMEM
        ),
    )(y2, x2, w1c, b1c, w2c, b2c, w_out, b_out)

    z = z.reshape(b_pad)[:B].reshape(B, Y_DIM)
    ld = ld.reshape(b_pad)[:B]
    return z, ld


def init_params(key, input_dim=INPUT_DIM, hidden_dim=HIDDEN_DIM):
    """Deterministic init mimicking nn.Linear's uniform(-1/sqrt(fan_in), ...)."""
    ks = jax.random.split(key, 6)

    def lin(kw, kb, fan_in, fan_out):
        bound = 1.0 / jnp.sqrt(fan_in)
        w = jax.random.uniform(kw, (fan_in, fan_out), jnp.float32, -bound, bound)
        b = jax.random.uniform(kb, (1, fan_out), jnp.float32, -bound, bound)
        return w, b

    w1, b1 = lin(ks[0], ks[1], input_dim, hidden_dim)
    w2, b2 = lin(ks[2], ks[3], hidden_dim, hidden_dim)
    w3, b3 = lin(ks[4], ks[5], hidden_dim, 2 * Y_DIM)
    return (w1, b1, w2, b2, w3, b3)


def _reference(y, x, params, dtype=jnp.float32):
    """Pure-JAX reference.  `dtype` sets the matmul-input quantization so the
    bf16 kernel path can be checked tightly against the same quantization."""
    w1, b1, w2, b2, w3, b3 = params

    def dot(a, b):
        return jnp.dot(a.astype(dtype), b.astype(dtype),
                       preferred_element_type=jnp.float32)

    x2 = x.reshape(x.shape[0], -1)
    h1 = jnp.maximum(dot(x2, w1) + b1, 0.0)
    h2 = jnp.maximum(dot(h1, w2) + b2, 0.0)
    p = dot(h2, w3) + b3
    mu, log_sigma = p[:, :Y_DIM], p[:, Y_DIM:]
    sigma = jnp.exp(log_sigma)
    y2 = y.reshape(-1, 1)
    z = jnp.tanh((y2 - mu) / sigma)
    ld = (-log_sigma).sum(-1) + jnp.log(1.0 - z ** 2 + 1e-6).sum(-1)
    return z, ld


if __name__ == "__main__":
    key = jax.random.PRNGKey(0)
    k_p, k_x, k_y = jax.random.split(key, 3)

    B = 256  # multiple of 128 -> no pad pass; 2 grid tiles (exercises megacore path)
    params = init_params(k_p)
    x = jax.random.normal(k_x, (B, INPUT_DIM), jnp.float32)
    y = jax.random.normal(k_y, (B,), jnp.float32)

    # 1) float32 compute path: exact-semantics check against the reference.
    z32, ld32 = nonlinear_flow_forward(y, x, params, compute_dtype=jnp.float32)
    jax.block_until_ready((z32, ld32))
    z_ref, ld_ref = _reference(y, x, params, dtype=jnp.float32)
    assert z32.shape == (B, Y_DIM) and ld32.shape == (B,)
    assert jnp.allclose(z32, z_ref, atol=1e-4, rtol=1e-4)
    assert jnp.allclose(ld32, ld_ref, atol=1e-4, rtol=1e-4)

    # 2) default bf16 matmul-input path (halves MXU-input width, f32 accumulate):
    #    compare against a reference with the same bf16 quantization at the
    #    matmul inputs.  NOTE: vs a pure-f32 PyTorch module the error is larger
    #    (bf16-level relative) -- intentional, surfaced to callers here.
    zbf, ldbf = nonlinear_flow_forward(y, x, params)
    jax.block_until_ready((zbf, ldbf))
    z_refq, ld_refq = _reference(y, x, params, dtype=jnp.bfloat16)
    assert zbf.shape == (B, Y_DIM) and ldbf.shape == (B,)
    assert jnp.allclose(zbf, z_refq, atol=2e-3, rtol=2e-3)
    assert jnp.allclose(ldbf, ld_refq, atol=2e-3, rtol=2e-3)

    # 3) ragged batch (B not a multiple of 128) exercises the pad fallback.
    Br = 40
    zr, ldr = nonlinear_flow_forward(y[:Br], x[:Br], params,
                                     compute_dtype=jnp.float32)
    jax.block_until_ready((zr, ldr))
    z_rr, ld_rr = _reference(y[:Br], x[:Br], params, dtype=jnp.float32)
    assert zr.shape == (Br, Y_DIM) and ldr.shape == (Br,)
    assert jnp.allclose(zr, z_rr, atol=1e-4, rtol=1e-4)
    assert jnp.allclose(ldr, ld_rr, atol=1e-4, rtol=1e-4)

    print("KERNEL_OK")
</pallas_src>

<mosaic_0001>
module attributes {stable_mosaic.version = 11 : i64} {
  func.func @kernel(%arg0: i32, %arg1: memref<1x1x128xf32, #tpu.memory_space<vmem>>, %arg2: memref<128x300xf32, #tpu.memory_space<vmem>>, %arg3: memref<300x64xf32, #tpu.memory_space<vmem>>, %arg4: memref<1x64xf32, #tpu.memory_space<vmem>>, %arg5: memref<64x64xf32, #tpu.memory_space<vmem>>, %arg6: memref<1x64xf32, #tpu.memory_space<vmem>>, %arg7: memref<2x64xf32, #tpu.memory_space<vmem>>, %arg8: memref<2x1xf32, #tpu.memory_space<vmem>>, %arg9: memref<1x1x128xf32, #tpu.memory_space<vmem>>, %arg10: memref<1x1x128xf32, #tpu.memory_space<vmem>>) attributes {dimension_semantics = [#tpu.dimension_semantics<parallel>], iteration_bounds = array<i64: 2>, scalar_prefetch = 0 : i64, scratch_operands = 0 : i64, tpu.core_type = #tpu.core_type<tc>, window_params = [{transform_indices = @transform_0, window_bounds = array<i64: 1, 1, 128>}, {transform_indices = @transform_1, window_bounds = array<i64: 128, 300>}, {pipeline_mode = #tpu.pipeline_mode<synchronous>, transform_indices = @transform_2, window_bounds = array<i64: 300, 64>}, {pipeline_mode = #tpu.pipeline_mode<synchronous>, transform_indices = @transform_3, window_bounds = array<i64: 1, 64>}, {pipeline_mode = #tpu.pipeline_mode<synchronous>, transform_indices = @transform_4, window_bounds = array<i64: 64, 64>}, {pipeline_mode = #tpu.pipeline_mode<synchronous>, transform_indices = @transform_5, window_bounds = array<i64: 1, 64>}, {pipeline_mode = #tpu.pipeline_mode<synchronous>, transform_indices = @transform_6, window_bounds = array<i64: 2, 64>}, {pipeline_mode = #tpu.pipeline_mode<synchronous>, transform_indices = @transform_7, window_bounds = array<i64: 2, 1>}, {transform_indices = @transform_8, window_bounds = array<i64: 1, 1, 128>}, {transform_indices = @transform_9, window_bounds = array<i64: 1, 1, 128>}]} {
    %c0 = arith.constant 0 : index
    %c0_0 = arith.constant 0 : index
    %0 = vector.load %arg2[%c0, %c0_0] : memref<128x300xf32, #tpu.memory_space<vmem>>, vector<128x300xf32>
    %c0_1 = arith.constant 0 : index
    %c0_2 = arith.constant 0 : index
    %1 = vector.load %arg3[%c0_1, %c0_2] : memref<300x64xf32, #tpu.memory_space<vmem>>, vector<300x64xf32>
    %cst = arith.constant dense<0.000000e+00> : vector<128x64xf32>
    %2 = tpu.matmul %0, %1, %cst {dimension_numbers = #tpu.dot_dimension_numbers<[1], [0], [0], [1], [0, 0, 1, 1], [], []>} : vector<128x300xf32>, vector<300x64xf32>, vector<128x64xf32> -> vector<128x64xf32>
    %c0_3 = arith.constant 0 : index
    %c0_4 = arith.constant 0 : index
    %3 = vector.load %arg4[%c0_3, %c0_4] : memref<1x64xf32, #tpu.memory_space<vmem>>, vector<1x64xf32>
    %4 = vector.broadcast %3 : vector<1x64xf32> to vector<128x64xf32>
    %5 = arith.addf %2, %4 : vector<128x64xf32>
    %cst_5 = arith.constant 0.000000e+00 : f32
    %6 = vector.broadcast %cst_5 : f32 to vector<128x64xf32>
    %7 = arith.maximumf %5, %6 : vector<128x64xf32>
    %c0_6 = arith.constant 0 : index
    %c0_7 = arith.constant 0 : index
    %8 = vector.load %arg5[%c0_6, %c0_7] : memref<64x64xf32, #tpu.memory_space<vmem>>, vector<64x64xf32>
    %cst_8 = arith.constant dense<0.000000e+00> : vector<128x64xf32>
    %9 = tpu.matmul %7, %8, %cst_8 {dimension_numbers = #tpu.dot_dimension_numbers<[1], [0], [0], [1], [0, 0, 1, 1], [], []>} : vector<128x64xf32>, vector<64x64xf32>, vector<128x64xf32> -> vector<128x64xf32>
    %c0_9 = arith.constant 0 : index
    %c0_10 = arith.constant 0 : index
    %10 = vector.load %arg6[%c0_9, %c0_10] : memref<1x64xf32, #tpu.memory_space<vmem>>, vector<1x64xf32>
    %11 = vector.broadcast %10 : vector<1x64xf32> to vector<128x64xf32>
    %12 = arith.addf %9, %11 : vector<128x64xf32>
    %cst_11 = arith.constant 0.000000e+00 : f32
    %13 = vector.broadcast %cst_11 : f32 to vector<128x64xf32>
    %14 = arith.maximumf %12, %13 : vector<128x64xf32>
    %c0_12 = arith.constant 0 : index
    %c0_13 = arith.constant 0 : index
    %15 = vector.load %arg7[%c0_12, %c0_13] : memref<2x64xf32, #tpu.memory_space<vmem>>, vector<2x64xf32>
    %cst_14 = arith.constant dense<0.000000e+00> : vector<2x128xf32>
    %16 = tpu.matmul %15, %14, %cst_14 {dimension_numbers = #tpu.dot_dimension_numbers<[1], [1], [0], [0], [0, 0, 1, 0], [], []>} : vector<2x64xf32>, vector<128x64xf32>, vector<2x128xf32> -> vector<2x128xf32>
    %c0_15 = arith.constant 0 : index
    %c0_16 = arith.constant 0 : index
    %17 = vector.load %arg8[%c0_15, %c0_16] : memref<2x1xf32, #tpu.memory_space<vmem>>, vector<2x1xf32>
    %18 = vector.broadcast %17 : vector<2x1xf32> to vector<2x128xf32>
    %19 = arith.addf %16, %18 : vector<2x128xf32>
    %20 = vector.extract_strided_slice %19 {offsets = [0, 0], sizes = [1, 128], strides = [1, 1]} : vector<2x128xf32> to vector<1x128xf32>
    %21 = vector.extract_strided_slice %19 {offsets = [1, 0], sizes = [1, 128], strides = [1, 1]} : vector<2x128xf32> to vector<1x128xf32>
    %c0_17 = arith.constant 0 : index
    %c0_18 = arith.constant 0 : index
    %c0_19 = arith.constant 0 : index
    %22 = vector.load %arg1[%c0_17, %c0_18, %c0_19] : memref<1x1x128xf32, #tpu.memory_space<vmem>>, vector<1x1x128xf32>
    %23 = vector.shape_cast %22 : vector<1x1x128xf32> to vector<1x128xf32>
    %24 = arith.subf %23, %20 : vector<1x128xf32>
    %cst_20 = arith.constant 0.000000e+00 : f32
    %25 = vector.broadcast %cst_20 : f32 to vector<1x128xf32>
    %26 = arith.subf %25, %21 : vector<1x128xf32>
    %27 = math.exp %26 : vector<1x128xf32>
    %28 = arith.mulf %24, %27 : vector<1x128xf32>
    %29 = math.tanh %28 : vector<1x128xf32>
    %c0_21 = arith.constant 0 : index
    %c0_22 = arith.constant 0 : index
    %c0_23 = arith.constant 0 : index
    %30 = vector.load %arg9[%c0_21, %c0_22, %c0_23] : memref<1x1x128xf32, #tpu.memory_space<vmem>>, vector<1x1x128xf32>
    %31 = vector.shape_cast %30 : vector<1x1x128xf32> to vector<1x128xf32>
    %32 = vector.shape_cast %29 : vector<1x128xf32> to vector<1x1x128xf32>
    tpu.vector_store %arg9[%c0_21, %c0_22, %c0_23], %32 {strides = array<i32>} : memref<1x1x128xf32, #tpu.memory_space<vmem>>, vector<1x1x128xf32>,
    %cst_24 = arith.constant 0.000000e+00 : f32
    %33 = vector.broadcast %cst_24 : f32 to vector<1x128xf32>
    %34 = arith.subf %33, %21 : vector<1x128xf32>
    %35 = arith.mulf %29, %29 : vector<1x128xf32>
    %cst_25 = arith.constant 1.000000e+00 : f32
    %36 = vector.broadcast %cst_25 : f32 to vector<1x128xf32>
    %37 = arith.subf %36, %35 : vector<1x128xf32>
    %cst_26 = arith.constant 9.99999997E-7 : f32
    %38 = vector.broadcast %cst_26 : f32 to vector<1x128xf32>
    %39 = arith.addf %37, %38 : vector<1x128xf32>
    %40 = math.log %39 : vector<1x128xf32>
    %41 = arith.addf %34, %40 : vector<1x128xf32>
    %c0_27 = arith.constant 0 : index
    %c0_28 = arith.constant 0 : index
    %c0_29 = arith.constant 0 : index
    %42 = vector.load %arg10[%c0_27, %c0_28, %c0_29] : memref<1x1x128xf32, #tpu.memory_space<vmem>>, vector<1x1x128xf32>
    %43 = vector.shape_cast %42 : vector<1x1x128xf32> to vector<1x128xf32>
    %44 = vector.shape_cast %41 : vector<1x128xf32> to vector<1x1x128xf32>
    tpu.vector_store %arg10[%c0_27, %c0_28, %c0_29], %44 {strides = array<i32>} : memref<1x1x128xf32, #tpu.memory_space<vmem>>, vector<1x1x128xf32>,
    return
  }
  func.func @transform_0(%arg0: i32) -> (i32, i32, i32) {
    %c0_i32 = arith.constant 0 : i32
    %c0_i32_0 = arith.constant 0 : i32
    %c0_i32_1 = arith.constant 0 : i32
    return %arg0, %c0_i32, %c0_i32_0 : i32, i32, i32
  }
  func.func @transform_1(%arg0: i32) -> (i32, i32) {
    %c0_i32 = arith.constant 0 : i32
    %c0_i32_0 = arith.constant 0 : i32
    return %arg0, %c0_i32 : i32, i32
  }
  func.func @transform_2(%arg0: i32) -> (i32, i32) {
    %c0_i32 = arith.constant 0 : i32
    %c0_i32_0 = arith.constant 0 : i32
    %c0_i32_1 = arith.constant 0 : i32
    return %c0_i32, %c0_i32_0 : i32, i32
  }
  func.func @transform_3(%arg0: i32) -> (i32, i32) {
    %c0_i32 = arith.constant 0 : i32
    %c0_i32_0 = arith.constant 0 : i32
    %c0_i32_1 = arith.constant 0 : i32
    return %c0_i32, %c0_i32_0 : i32, i32
  }
  func.func @transform_4(%arg0: i32) -> (i32, i32) {
    %c0_i32 = arith.constant 0 : i32
    %c0_i32_0 = arith.constant 0 : i32
    %c0_i32_1 = arith.constant 0 : i32
    return %c0_i32, %c0_i32_0 : i32, i32
  }
  func.func @transform_5(%arg0: i32) -> (i32, i32) {
    %c0_i32 = arith.constant 0 : i32
    %c0_i32_0 = arith.constant 0 : i32
    %c0_i32_1 = arith.constant 0 : i32
    return %c0_i32, %c0_i32_0 : i32, i32
  }
  func.func @transform_6(%arg0: i32) -> (i32, i32) {
    %c0_i32 = arith.constant 0 : i32
    %c0_i32_0 = arith.constant 0 : i32
    %c0_i32_1 = arith.constant 0 : i32
    return %c0_i32, %c0_i32_0 : i32, i32
  }
  func.func @transform_7(%arg0: i32) -> (i32, i32) {
    %c0_i32 = arith.constant 0 : i32
    %c0_i32_0 = arith.constant 0 : i32
    %c0_i32_1 = arith.constant 0 : i32
    return %c0_i32, %c0_i32_0 : i32, i32
  }
  func.func @transform_8(%arg0: i32) -> (i32, i32, i32) {
    %c0_i32 = arith.constant 0 : i32
    %c0_i32_0 = arith.constant 0 : i32
    %c0_i32_1 = arith.constant 0 : i32
    return %arg0, %c0_i32, %c0_i32_0 : i32, i32, i32
  }
  func.func @transform_9(%arg0: i32) -> (i32, i32, i32) {
    %c0_i32 = arith.constant 0 : i32
    %c0_i32_0 = arith.constant 0 : i32
    %c0_i32_1 = arith.constant 0 : i32
    return %arg0, %c0_i32, %c0_i32_0 : i32, i32, i32
  }
}

</mosaic_0001>

<bundles_post_ra>
// kernel: tpu_custom_call.1
= control target key start
LH: loop header
LB: loop body
LE: loop exit
PB: predicated region body
PF: predicated region fallthrough
CT: control target
= control target key end

     0   :  { %15 = vsyncpa [#allocation3], 0  ;;  %s2429_s0 = inlined_call_operand.vmem [shape: f32[2,1,128], index: 0, kind: input, shape index: {}]   ;;  %s2430_s1 = inlined_call_operand.vmem [shape: f32[256,300], index: 1, kind: input, shape index: {}]   ;;  %s2431_s2 = inlined_call_operand.vmem [shape: f32[300,64], index: 2, kind: input, shape index: {}]   ;;  %s2432_s3 = inlined_call_operand.vmem [shape: f32[1,64], index: 3, kind: input, shape index: {}]   ;;  %s2433_s4 = inlined_call_operand.vmem [shape: f32[64,64], index: 4, kind: input, shape index: {}]   ;;  %s2434_s5 = inlined_call_operand.vmem [shape: f32[1,64], index: 5, kind: input, shape index: {}]   ;;  %s2435_s6 = inlined_call_operand.vmem [shape: f32[2,64], index: 6, kind: input, shape index: {}]   ;;  %s2436_s7 = inlined_call_operand.vmem [shape: f32[2,1], index: 7, kind: input, shape index: {}]   ;;  %s2437_s8 = inlined_call_operand.hbm [shape: f32[2,1,128], index: 8, kind: output, shape index: {0}]   ;;  %s2438_s9 = inlined_call_operand.hbm [shape: f32[2,1,128], index: 9, kind: output, shape index: {1}]  }
   0x1   :  { %17 = vsyncpa [#allocation3 + $0x1], 0 }
   0x2   :  { %18 = vsyncpa [#allocation5], 0 }
   0x3   :  { %20 = vsyncpa [#allocation5 + $0x1], 0  ;;  %s1946_s30 = smov 0   ;;  %s1948_s10 = smov 0  }
   0x4   :  { %s1950_s11 = smov 0   ;;  %s1952_s12 = smov 0  }
   0x5 LB: > { %s1967_s13 = sadd.s32 4294967295, %s1886_s12   ;;  %s1324_s14 = sadd.s32 4294967294, %s1886_s12   ;;  %s1886_s12 = sphi %s1952_s12, %s2450_s12   ;;  %s1882_s11 = sphi %s1950_s11, %s2449_s11   ;;  %s1878_s10 = sphi %s1948_s10, %s2448_s10   ;;  %s1874_s30 = sphi %s1946_s30, %s2447_s30  }
   0x6   : > { %s1971_s15 = sadd.s32 1, %s1886_s12   ;;  %s211_s16 = sadd.s32 1, %s1882_s11 }
   0x7   : > { %s208_s17 = ssub.s32 %s1886_s12, %s1971_s15  ;;  %p221_p0 = scmp.ne.s32.totalorder %s1882_s11, %s1878_s10 }
   0x8   : > { %p209_p1 = scmp.eq.s32.totalorder %s208_s17, 0  ;;  %p222_p2 = scmp.eq.s32.totalorder %s1967_s13, 1 }
   0x9   : > { %p227_p3 = scmp.ne.s32.totalorder %s1878_s10, %s1874_s30  ;;  %p228_p4 = scmp.eq.s32.totalorder %s1324_s14, 1 }
   0xa   : > { %s1982_s18 = scalar_select %p209_p1, %s1882_s11, %s211_s16  }
   0xb   : > { %p1984_p5 = por %p222_p2, %p221_p0  ;;  %p1988_p6 = por %p228_p4, %p227_p3 }
   0xc   : > { %2439 = sst [smem:[#allocation8_spill]] %s1982_s18  ;;  %p1327_p7 = scmp.ge.s32.totalorder %s1886_s12, 1 }
   0xd   : > { %p306_p8 = scmp.lt.s32.totalorder %s1886_s12, 3 }
   0xf   : > { %p307_p9 = pnand %p1327_p7, %p306_p8 }
  0x10   : > { %v423_v0 = vld [vmem:[%s2431_s2 + $0x80] sm:$0xff] (!%p307_p9)  ;;  %v424_v1 = vld [vmem:[%s2431_s2 + $0x88] sm:$0xff] (!%p307_p9)  ;;  %s2004_s27 = sshll.u32 (!%p307_p9), %s1967_s13, 4  ;;  %v425_v5 = vld [vmem:[%s2431_s2 + $0x90] sm:$0xff] (!%p307_p9)  ;;  %vm501_vm0 = vcmask (!%p307_p9), 1043456   ;;  %vm452_vm1 = vcmask (!%p307_p9), 359424  }
  0x11   : > { %310 = sbr.rel (%p307_p9) target bundleno = 854 (0x356), region = 52  ;;  %v407_v2 = vld [vmem:[%s2431_s2] sm:$0xff] (!%p307_p9)  ;;  %v1640_v3 = vpack.c.bf16 (!%p307_p9), %v424_v1, %v423_v0  ;;  %v408_v4 = vld [vmem:[%s2431_s2 + $0x8] sm:$0xff] (!%p307_p9)  ;;  %v426_v6 = vld [vmem:[%s2431_s2 + $0x98] sm:$0xff] (!%p307_p9)  ;;  %p353_p10 = scmp.lt.s32.totalorder (!%p307_p9), %s2004_s27, 31  ;;  %vm1888_vm2 = vmmov (!%p307_p9), 1  }
  0x12   : > { %v1642_v7 = vpack.c.bf16 (!%p307_p9), %v408_v4, %v407_v2  ;;  %v1644_v8 = vpack.c.bf16 (!%p307_p9), %v426_v6, %v425_v5  ;;  %v409_v9 = vld [vmem:[%s2431_s2 + $0x10] sm:$0xff] (!%p307_p9)  ;;  %v410_v10 = vld [vmem:[%s2431_s2 + $0x18] sm:$0xff] (!%p307_p9)  ;;  %v427_v11 = vld [vmem:[%s2431_s2 + $0xa0] sm:$0xff] (!%p307_p9)  ;;  %vm826_vm4 = vcmask (!%p307_p9), 523264   ;;  %vm1890_vm5 = vmmov (!%p307_p9), 0   ;;  %p349_p11 = scmp.lt.s32.totalorder (!%p307_p9), %s1967_s13, 1 }
  0x13   : > { %1641 = vmatprep.subr.bf16.mxu0 (!%p307_p9), %v1640_v3  ;;  %v428_v12 = vld [vmem:[%s2431_s2 + $0xa8] sm:$0xff] (!%p307_p9)  ;;  %v1646_v13 = vpack.c.bf16 (!%p307_p9), %v410_v10, %v409_v9  ;;  %v411_v15 = vld [vmem:[%s2431_s2 + $0x20] sm:$0xff] (!%p307_p9)  ;;  %v429_v17 = vld [vmem:[%s2431_s2 + $0xb0] sm:$0xff] (!%p307_p9)  ;;  %s2346_s18 = sand.u32 (!%p307_p9), 1, %s1878_s10   ;;  %s1894_s23 = smov (!%p307_p9), [#allocation2]  }
  0x14   : > { %1643 = vmatpush3.bf16.msra.mxu0 (!%p307_p9), %v1642_v7  ;;  %v1648_v14 = vpack.c.bf16 (!%p307_p9), %v428_v12, %v427_v11  ;;  %v412_v16 = vld [vmem:[%s2431_s2 + $0x28] sm:$0xff] (!%p307_p9)  ;;  %v430_v18 = vld [vmem:[%s2431_s2 + $0xb8] sm:$0xff] (!%p307_p9)  ;;  %v439_v20 = vld [vmem:[%s2431_s2 + $0x100] sm:$0xff] (!%p307_p9)  ;;  %s1796_s25 = sshll.u32 (!%p307_p9), %s1894_s23, 4  ;;  %s1797_s25 = int_to_ptr.vmem [resolvable:$false] %s1796_s25 }
  0x15   : > { %1645 = vmatprep.subr.bf16.mxu0 (!%p307_p9), %v1644_v8  ;;  %v1650_v19 = vpack.c.bf16 (!%p307_p9), %v412_v16, %v411_v15  ;;  %v1652_v21 = vpack.c.bf16 (!%p307_p9), %v430_v18, %v429_v17  ;;  %v413_v22 = vld [vmem:[%s2431_s2 + $0x30] sm:$0xff] (!%p307_p9)  ;;  %v414_v23 = vld [vmem:[%s2431_s2 + $0x38] sm:$0xff] (!%p307_p9)  ;;  %v440_v24 = vld [vmem:[%s2431_s2 + $0x108] sm:$0xff] (!%p307_p9) }
  0x16   : > { %v431_v25 = vld [vmem:[%s2431_s2 + $0xc0] sm:$0xff] (!%p307_p9)  ;;  %v432_v26 = vld [vmem:[%s2431_s2 + $0xc8] sm:$0xff] (!%p307_p9)  ;;  %v1672_v27 = vpack.c.bf16 (!%p307_p9), %v440_v24, %v439_v20  ;;  %v441_v28 = vld [vmem:[%s2431_s2 + $0x110] sm:$0xff] (!%p307_p9)  ;;  %v1654_v30 = vpack.c.bf16 (!%p307_p9), %v414_v23, %v413_v22 }
  0x17   : > { %v442_v29 = vld [vmem:[%s2431_s2 + $0x118] sm:$0xff] (!%p307_p9)  ;;  %v443_v33 = vld [vmem:[%s2431_s2 + $0x120] sm:$0xff] (!%p307_p9)  ;;  %v1656_v34 = vpack.c.bf16 (!%p307_p9), %v432_v26, %v431_v25  ;;  %v416_v36 = vld [vmem:[%s2431_s2 + $0x48] sm:$0xff] (!%p307_p9) }
  0x18   : > { %s354_s16 = scalar_select %p353_p10, %s2004_s27, 31  ;;  %1647 = vmatpush3.bf16.msra.mxu0 %v1646_v13  ;;  %1673 = vmatprep.subr.bf16.mxu1 %v1672_v27  ;;  %v1676_v31 = vpack.c.bf16 %v442_v29, %v441_v28  ;;  %v415_v35 = vld [vmem:[%s2431_s2 + $0x40] sm:$0xff]  ;;  %v444_v37 = vld [vmem:[%s2431_s2 + $0x128] sm:$0xf]  ;;  %v433_v38 = vld [vmem:[%s2431_s2 + $0xd0] sm:$0xff] }
  0x19   : > { %1649 = vmatprep.subr.bf16.mxu0 %v1648_v14  ;;  %1675 = vmatpush3.bf16.msra.mxu1 %v1672_v27  ;;  %v434_v39 = vld [vmem:[%s2431_s2 + $0xd8] sm:$0xff]  ;;  %v1680_v40 = vpack.c.bf16 %v444_v37, %v443_v33  ;;  %vm2091_vm3 = vmpackc.low %vm501_vm0, %vm1888_vm2  ;;  %v1658_v43 = vpack.c.bf16 %v416_v36, %v415_v35  ;;  %v417_v45 = vld [vmem:[%s2431_s2 + $0x50] sm:$0xff]  ;;  %s2452_s13 = smov (!%p349_p11, %s1967_s13), 1 }
  0x1a   : > { %s1734_s24 = smul.u32 24, %s354_s16  ;;  %1677 = vmatprep.subr.bf16.mxu1 %v1676_v31  ;;  %v1660_v44 = vpack.c.bf16 %v434_v39, %v433_v38  ;;  %v418_v46 = vld [vmem:[%s2431_s2 + $0x58] sm:$0xff]  ;;  %v435_v47 = vld [vmem:[%s2431_s2 + $0xe0] sm:$0xff]  ;;  %v436_v48 = vld [vmem:[%s2431_s2 + $0xe8] sm:$0xff]  ;;  %s351_s28 = scalar_lea.vmem %s2429_s0, %s2452_s13 }
  0x1b   : > { %v1662_v49 = vpack.c.bf16 %v418_v46, %v417_v45  ;;  %v1664_v50 = vpack.c.bf16 %v436_v48, %v435_v47  ;;  %v419_v51 = vld [vmem:[%s2431_s2 + $0x60] sm:$0xff]  ;;  %v420_v52 = vld [vmem:[%s2431_s2 + $0x68] sm:$0xff]  ;;  %v437_v54 = vld [vmem:[%s2431_s2 + $0xf0] sm:$0xff]  ;;  %s2353_s13 = scalar_lea.hbm %s2437_s8, %s2004_s27  ;;  %s1203_s16 = scalar_lea.sflag [#allocation3], %s2346_s18 }
  0x1c   : > { %s2056_s29 = scalar_lea.vmem %s2430_s1, %s1734_s24  ;;  %1651 = vmatpush3.bf16.msra.mxu0 %v1650_v19  ;;  %v438_v55 = vld [vmem:[%s2431_s2 + $0xf8] sm:$0xff]  ;;  %v1666_v57 = vpack.c.bf16 %v420_v52, %v419_v51  ;;  %v421_v59 = vld [vmem:[%s2431_s2 + $0x70] sm:$0xff]  ;;  %v811_v1 = vld [vmem:[%s2433_s4] sm:$0xff]  ;;  %s1798_s24 = scalar_lea.vmem %s1797_s25, 32 }
  0x1d   : > { %v360_v32 = vld [vmem:[%s2056_s29 + $0x8] sm:$0xff]  ;;  %1653 = vmatprep.subr.bf16.mxu0 %v1652_v21  ;;  %v361_v41 = vld [vmem:[%s2056_s29 + $0x10] sm:$0xff]  ;;  %1679 = vmatpush3.bf16.msra.mxu1 %v1676_v31  ;;  %v367_v56 = vld [vmem:[%s2056_s29 + $0x40] sm:$0xff]  ;;  %v1668_v58 = vpack.c.bf16 %v438_v55, %v437_v54 }
  0x1e   : > { %569 = vmatprep.mubr.f32.mxu0 %v360_v32  ;;  %1541 = vmatprep.mubr.msk.f32.mxu1 %vm452_vm1, %v361_v41  ;;  %v364_v53 = vld [vmem:[%s2056_s29 + $0x28] sm:$0xff]  ;;  %v422_v60 = vld [vmem:[%s2431_s2 + $0x78] sm:$0xff]  ;;  %v373_v62 = vld [vmem:[%s2056_s29 + $0x70] sm:$0xff] }
  0x1f   : > { %1682 = vmatprep.subr.msk.bf16.mxu1 %vm2091_vm3, %v1680_v40  ;;  %v370_v61 = vld [vmem:[%s2056_s29 + $0x58] sm:$0xff]  ;;  %v1670_v63 = vpack.c.bf16 %v422_v60, %v421_v59  ;;  %v376_v0 = vld [vmem:[%s2056_s29 + $0x88] sm:$0xff]  ;;  %v813_v3 = vld [vmem:[%s2433_s4 + $0x10] sm:$0xff] }
  0x20   : > { %1655 = vmatpush3.bf16.msra.mxu0 %v1654_v30  ;;  %v812_v2 = vld [vmem:[%s2433_s4 + $0x8] sm:$0xff]  ;;  %v379_v4 = vld [vmem:[%s2056_s29 + $0xa0] sm:$0xff]  ;;  %v814_v6 = vld [vmem:[%s2433_s4 + $0x18] sm:$0xff] }
  0x21   : > { %1657 = vmatprep.subr.bf16.mxu0 %v1656_v34  ;;  %1685 = vmatpush3.bf16.msk.msra.mxu1 %vm2091_vm3, %v1680_v40  ;;  %v1686_v5 = vpack.c.bf16 %v812_v2, %v811_v1  ;;  %v1690_v7 = vpack.c.bf16 %v814_v6, %v813_v3  ;;  %v359_v8 = vld [vmem:[%s2056_s29] sm:$0xff]  ;;  %v816_v10 = vld [vmem:[%s2433_s4 + $0x28] sm:$0xff]  ;;  %v382_v12 = vld [vmem:[%s2056_s29 + $0xb8] sm:$0xff] }
  0x22   : > { %v815_v9 = vld [vmem:[%s2433_s4 + $0x20] sm:$0xff]  ;;  %v385_v13 = vld [vmem:[%s2056_s29 + $0xd0] sm:$0xff]  ;;  %v362_v15 = vld [vmem:[%s2056_s29 + $0x18] sm:$0xff] }
  0x23   : > { %v363_v11 = vld [vmem:[%s2056_s29 + $0x20] sm:$0xff]  ;;  %1687 = vmatprep.subr.bf16.mxu1 %v1686_v5  ;;  %v1694_v14 = vpack.c.bf16 %v816_v10, %v815_v9  ;;  %v366_v16 = vld [vmem:[%s2056_s29 + $0x38] sm:$0xff]  ;;  %v388_v17 = vld [vmem:[%s2056_s29 + $0xe8] sm:$0xff] }
  0x24   : > { %1659 = vmatpush3.bf16.msra.mxu0 %v1658_v43  ;;  %1542 = vmatmul.mubr.msk.f32.vlgmr.msra.gmra.mrb[0].mxu1 %vm452_vm1, %v364_v53  ;;  %v391_v18 = vld [vmem:[%s2056_s29 + $0x100] sm:$0xff]  ;;  %v365_v19 = vld [vmem:[%s2056_s29 + $0x30] sm:$0xff]  ;;  %v394_v21 = vld [vmem:[%s2056_s29 + $0x118] sm:$0xff] }
  0x25   : > { %1661 = vmatprep.subr.bf16.mxu0 %v1660_v44  ;;  %1544 = vmatprep.mubr.msk.f32.mxu1 %vm452_vm1, %v367_v56  ;;  %v369_v20 = vld [vmem:[%s2056_s29 + $0x50] sm:$0xff]  ;;  %v368_v23 = vld [vmem:[%s2056_s29 + $0x48] sm:$0xff]  ;;  %v403_v26 = vld [vmem:[%s2056_s29 + $0x160] sm:$0xff] }
  0x26   : > { %1689 = vmatpush3.bf16.msra.mxu1 %v1686_v5  ;;  %v397_v22 = vld [vmem:[%s2056_s29 + $0x130] sm:$0xff]  ;;  %v372_v24 = vld [vmem:[%s2056_s29 + $0x68] sm:$0xff]  ;;  %v371_v27 = vld [vmem:[%s2056_s29 + $0x60] sm:$0xff] }
  0x27   : > { %1691 = vmatprep.subr.bf16.mxu1 %v1690_v7  ;;  %v400_v25 = vld [vmem:[%s2056_s29 + $0x148] sm:$0xff]  ;;  %v375_v28 = vld [vmem:[%s2056_s29 + $0x80] sm:$0xff]  ;;  %v406_v29 = vld [vmem:[%s2056_s29 + $0x178] sm:$0xff] }
  0x28   : > { %1663 = vmatpush3.bf16.msra.mxu0 %v1662_v49  ;;  %1545 = vmatmul.mubr.msk.f32.gmra.mrb[2].mxu1 %vm452_vm1, %v370_v61  ;;  %v374_v30 = vld [vmem:[%s2056_s29 + $0x78] sm:$0xff]  ;;  %v377_v32 = vld [vmem:[%s2056_s29 + $0x90] sm:$0xff]  ;;  %v380_v34 = vld [vmem:[%s2056_s29 + $0xa8] sm:$0xff] }
  0x29   : > { %1665 = vmatprep.subr.bf16.mxu0 %v1664_v50  ;;  %1547 = vmatprep.mubr.msk.f32.mxu1 %vm452_vm1, %v373_v62  ;;  %v378_v31 = vld [vmem:[%s2056_s29 + $0x98] sm:$0xff]  ;;  %v381_v33 = vld [vmem:[%s2056_s29 + $0xb0] sm:$0xff]  ;;  %v384_v35 = vld [vmem:[%s2056_s29 + $0xc8] sm:$0xff] }
  0x2a   : > { %1693 = vmatpush3.bf16.msra.mxu1 %v1690_v7  ;;  %v383_v36 = vld [vmem:[%s2056_s29 + $0xc0] sm:$0xff]  ;;  %v386_v38 = vld [vmem:[%s2056_s29 + $0xd8] sm:$0xff]  ;;  %v389_v40 = vld [vmem:[%s2056_s29 + $0xf0] sm:$0xff] }
  0x2b   : > { %1695 = vmatprep.subr.bf16.mxu1 %v1694_v14  ;;  %v387_v37 = vld [vmem:[%s2056_s29 + $0xe0] sm:$0xff]  ;;  %v390_v39 = vld [vmem:[%s2056_s29 + $0xf8] sm:$0xff]  ;;  %v393_v41 = vld [vmem:[%s2056_s29 + $0x110] sm:$0xff] }
  0x2c   : > { %1667 = vmatpush3.bf16.msra.mxu0 %v1666_v57  ;;  %1548 = vmatmul.mubr.msk.f32.gmra.mrb[4].mxu1 %vm452_vm1, %v376_v0  ;;  %v392_v42 = vld [vmem:[%s2056_s29 + $0x108] sm:$0xff]  ;;  %v395_v44 = vld [vmem:[%s2056_s29 + $0x120] sm:$0xff]  ;;  %v398_v46 = vld [vmem:[%s2056_s29 + $0x138] sm:$0xff] }
  0x2d   : > { %1669 = vmatprep.subr.bf16.mxu0 %v1668_v58  ;;  %1550 = vmatprep.mubr.msk.f32.mxu1 %vm452_vm1, %v379_v4  ;;  %v396_v43 = vld [vmem:[%s2056_s29 + $0x128] sm:$0xff]  ;;  %v399_v45 = vld [vmem:[%s2056_s29 + $0x140] sm:$0xff]  ;;  %v402_v47 = vld [vmem:[%s2056_s29 + $0x158] sm:$0xff] }
  0x2e   : > { %1697 = vmatpush3.bf16.msra.mxu1 %v1694_v14  ;;  %v401_v48 = vld [vmem:[%s2056_s29 + $0x150] sm:$0xff]  ;;  %v404_v50 = vld [vmem:[%s2056_s29 + $0x168] sm:$0xff]  ;;  %v818_v52 = vld [vmem:[%s2433_s4 + $0x38] sm:$0xff] }
  0x2f   : > { %v405_v49 = vld [vmem:[%s2056_s29 + $0x170] sm:$0xff]  ;;  %v2218_v62 = vld [vmem:[%s2432_s3] ss:$0 sm:$0xff]  ;;  %vm2289_vm6 = vmpackc.low %vm826_vm4, %vm826_vm4  ;;  %s342_s29 = scalar_lea.vmem [#allocation2], %s2346_s18 }
  0x30   : > { %1671 = vmatpush3.bf16.msra.mxu0 %v1670_v63  ;;  %1551 = vmatmul.mubr.msk.f32.gmra.mrb[6].mxu1 %vm452_vm1, %v382_v12  ;;  %v817_v51 = vld [vmem:[%s2433_s4 + $0x30] sm:$0xff]  ;;  %s1219_s14 = sshll.u32 %s342_s29, 4  ;;  %s2355_s14 = int_to_ptr.vmem [resolvable:$true] %s1219_s14 }
  0x31   : > { %1553 = vmatprep.mubr.msk.f32.mxu1 %vm452_vm1, %v385_v13  ;;  %v1698_v53 = vpack.c.bf16 %v818_v52, %v817_v51  ;;  %s1792_s22 = scalar_lea.vmem %s2355_s14, 16  ;;  %p1799_p1 = scmp.lt.s32.totalorder %s2355_s14, %s1797_s25 }
  0x32   : > { %p1793_p12 = scmp.ne.s32.totalorder %s2355_s14, %s1792_s22  ;;  %p1800_p2 = scmp.lt.s32.totalorder %s1798_s24, %s1792_s22 }
  0x33   : > { %570 = vmatmul.mubr.f32.vlgmr.msra.gmra.mrb[0].mxu0 %v359_v8  ;;  %1699 = vmatprep.subr.bf16.mxu1 %v1698_v53 }
  0x34   : > { %574 = vmatprep.mubr.f32.mxu0 %v363_v11  ;;  %1554 = vmatmul.mubr.msk.f32.gmra.mrb[8].mxu1 %vm452_vm1, %v388_v17  ;;  %p1794_p13 = pnand %p1793_p12, %p1984_p5  ;;  %p1801_p3 = por %p1800_p2, %p1799_p1 }
  0x35   : > { %1556 = vmatprep.mubr.msk.f32.mxu1 %vm452_vm1, %v391_v18  ;;  %1701 = vmatpush3.bf16.msra.mxu1 %v1698_v53 }
  0x36   : > { %p1795_p0 = pneg %p1794_p13 }
  0x37   : > { %575 = vmatmul.mubr.f32.gmra.mrb[2].mxu0 %v362_v15 }
  0x38   : > { %579 = vmatprep.mubr.f32.mxu0 %v366_v16  ;;  %1557 = vmatmul.mubr.msk.f32.gmra.mrb[10].mxu1 %vm452_vm1, %v394_v21  ;;  %p1802_p4 = pnand %p1801_p3, %p1795_p0 }
  0x39   : > { %1559 = vmatprep.mubr.msk.f32.mxu1 %vm452_vm1, %v397_v22 }
  0x3b   : > { %580 = vmatmul.mubr.f32.gmra.mrb[4].mxu0 %v365_v19 }
  0x3c   : > { %584 = vmatprep.mubr.f32.mxu0 %v369_v20  ;;  %1560 = vmatmul.mubr.msk.f32.gmra.mrb[12].mxu1 %vm452_vm1, %v400_v25 }
  0x3d   : > { %1562 = vmatprep.mubr.msk.f32.mxu1 %vm452_vm1, %v403_v26 }
  0x3f   : > { %585 = vmatmul.mubr.f32.gmra.mrb[6].mxu0 %v368_v23 }
  0x40   : > { %589 = vmatprep.mubr.f32.mxu0 %v372_v24  ;;  %1563 = vmatmul.mubr.msk.f32.gmra.mrb[14].mxu1 %vm452_vm1, %v406_v29 }
  0x43   : > { %590 = vmatmul.mubr.f32.gmra.mrb[8].mxu0 %v371_v27 }
  0x44   : > { %594 = vmatprep.mubr.f32.mxu0 %v375_v28 }
  0x47   : > { %595 = vmatmul.mubr.f32.gmra.mrb[10].mxu0 %v374_v30 }
  0x48   : > { %599 = vmatprep.mubr.f32.mxu0 %v378_v31 }
  0x4b   : > { %600 = vmatmul.mubr.f32.gmra.mrb[12].mxu0 %v377_v32 }
  0x4c   : > { %604 = vmatprep.mubr.f32.mxu0 %v381_v33 }
  0x4f   : > { %605 = vmatmul.mubr.f32.gmra.mrb[14].mxu0 %v380_v34 }
  0x50   : > { %609 = vmatprep.mubr.f32.mxu0 %v384_v35 }
  0x53   : > { %610 = vmatmul.mubr.f32.gmra.mrb[16].mxu0 %v383_v36 }
  0x54   : > { %614 = vmatprep.mubr.f32.mxu0 %v387_v37 }
  0x57   : > { %615 = vmatmul.mubr.f32.gmra.mrb[18].mxu0 %v386_v38 }
  0x58   : > { %619 = vmatprep.mubr.f32.mxu0 %v390_v39 }
  0x5b   : > { %620 = vmatmul.mubr.f32.gmra.mrb[20].mxu0 %v389_v40 }
  0x5c   : > { %624 = vmatprep.mubr.f32.mxu0 %v393_v41 }
  0x5f   : > { %625 = vmatmul.mubr.f32.gmra.mrb[22].mxu0 %v392_v42 }
  0x60   : > { %629 = vmatprep.mubr.f32.mxu0 %v396_v43 }
  0x63   : > { %630 = vmatmul.mubr.f32.gmra.mrb[24].mxu0 %v395_v44 }
  0x64   : > { %634 = vmatprep.mubr.f32.mxu0 %v399_v45 }
  0x67   : > { %635 = vmatmul.mubr.f32.gmra.mrb[26].mxu0 %v398_v46 }
  0x68   : > { %639 = vmatprep.mubr.f32.mxu0 %v402_v47 }
  0x6b   : > { %640 = vmatmul.mubr.f32.gmra.mrb[28].mxu0 %v401_v48 }
  0x6c   : > { %644 = vmatprep.mubr.f32.mxu0 %v405_v49 }
  0x6f   : > { %645 = vmatmul.mubr.f32.gmra.mrb[30].mxu0 %v404_v50 }
  0xf7   : > { %v1543_v54 = vpop.f32.mrb[0].mxu1 }
  0xf8   : > { %v716_v55 = vpop.f32.mrb[1].mxu1 }
  0xfb   : > { %v1546_v56 = vpop.f32.mrb[2].mxu1 }
  0xfc   : > { %v726_v57 = vpop.f32.mrb[3].mxu1 }
  0xff   : > { %v1549_v58 = vpop.f32.mrb[4].mxu1 }
 0x100   : > { %v736_v59 = vpop.f32.mrb[5].mxu1 }
 0x103   : > { %v2220_v63 = vpop.f32.mrb[6].mxu1 }
 0x104   : > { %v746_v1 = vpop.f32.mrb[7].mxu1 }
 0x106   : > { %v1418_v60 = vpop.f32.mrb[0].mxu0 }
 0x107   : > { %v1419_v61 = vpop.f32.mrb[1].mxu0  ;;  %v2223_v5 = vpop.f32.mrb[8].mxu1 }
 0x108   : > { %v1420_v0 = vadd.f32 %v1419_v61, %v1418_v60  ;;  %v756_v8 = vpop.f32.mrb[9].mxu1 }
 0x10a   : > { %v1421_v2 = vpop.f32.mrb[2].mxu0  ;;  %v572_v3 = vadd.f32 %v1420_v0, %v2218_v62 }
 0x10b   : > { %v1422_v4 = vpop.f32.mrb[3].mxu0  ;;  %v2226_v13 = vpop.f32.mrb[10].mxu1 }
 0x10c   : > { %v1423_v6 = vadd.f32 %v1422_v4, %v1421_v2  ;;  %v717_v7 = vadd.f32 %v716_v55, %v572_v3  ;;  %v2229_v16 = vpop.f32.mrb[11].mxu1 }
 0x10e   : > { %v577_v9 = vadd.f32 %v1423_v6, %v2218_v62  ;;  %v795_v10 = vmax.f32 %v717_v7, 0.0  ;;  %v1424_v11 = vpop.f32.mrb[4].mxu0 }
 0x10f   : > { %v1425_v12 = vpop.f32.mrb[5].mxu0  ;;  %v2232_v21 = vpop.f32.mrb[12].mxu1 }
 0x110   : > { %v722_v14 = vadd.f32 %v1543_v54, %v577_v9  ;;  %v1426_v15 = vadd.f32 %v1425_v12, %v1424_v11  ;;  %1581 = vmatprep.mubr.msk.f32.mxu1 %vm826_vm4, %v795_v10  ;;  %v2235_v24 = vpop.f32.mrb[13].mxu1 }
 0x112   : > { %v796_v17 = vmax.f32 %v722_v14, 0.0  ;;  %v1427_v18 = vpop.f32.mrb[6].mxu0  ;;  %v582_v19 = vadd.f32 %v1426_v15, %v2218_v62 }
 0x113   : > { %v1428_v20 = vpop.f32.mrb[7].mxu0  ;;  %v2238_v29 = vpop.f32.mrb[14].mxu1 }
 0x114   : > { %v1429_v22 = vadd.f32 %v1428_v20, %v1427_v18  ;;  %v727_v23 = vadd.f32 %v726_v57, %v582_v19  ;;  %1582 = vmatmul.mubr.msk.f32.vlgmr.msra.gmra.mrb[16].mxu1 %vm826_vm4, %v796_v17  ;;  %v2241_v32 = vpop.f32.mrb[15].mxu1 }
 0x116   : > { %v587_v25 = vadd.f32 %v1429_v22, %v2218_v62  ;;  %v797_v26 = vmax.f32 %v727_v23, 0.0  ;;  %v1430_v27 = vpop.f32.mrb[8].mxu0 }
 0x117   : > { %v1431_v28 = vpop.f32.mrb[9].mxu0 }
 0x118   : > { %v732_v30 = vadd.f32 %v1546_v56, %v587_v25  ;;  %v1432_v31 = vadd.f32 %v1431_v28, %v1430_v27  ;;  %1584 = vmatprep.mubr.msk.f32.mxu1 %vm826_vm4, %v797_v26 }
 0x11a   : > { %v798_v33 = vmax.f32 %v732_v30, 0.0  ;;  %v1433_v34 = vpop.f32.mrb[10].mxu0  ;;  %v592_v35 = vadd.f32 %v1432_v31, %v2218_v62 }
 0x11b   : > { %v1434_v36 = vpop.f32.mrb[11].mxu0 }
 0x11c   : > { %v1435_v37 = vadd.f32 %v1434_v36, %v1433_v34  ;;  %v737_v38 = vadd.f32 %v736_v59, %v592_v35  ;;  %1585 = vmatmul.mubr.msk.f32.gmra.mrb[18].mxu1 %vm826_vm4, %v798_v33 }
 0x11e   : > { %v597_v39 = vadd.f32 %v1435_v37, %v2218_v62  ;;  %v799_v40 = vmax.f32 %v737_v38, 0.0  ;;  %v1436_v41 = vpop.f32.mrb[12].mxu0 }
 0x11f   : > { %v1437_v42 = vpop.f32.mrb[13].mxu0 }
 0x120   : > { %v742_v43 = vadd.f32 %v1549_v58, %v597_v39  ;;  %v1438_v44 = vadd.f32 %v1437_v42, %v1436_v41  ;;  %1587 = vmatprep.mubr.msk.f32.mxu1 %vm826_vm4, %v799_v40  ;;  %v1889_v42 = vmov 0.0|0.0  }
 0x121   : > { %1702 = vmatprep.subr.bf16.mxu0 %v1889_v42 }
 0x122   : > { %v800_v45 = vmax.f32 %v742_v43, 0.0  ;;  %v1439_v46 = vpop.f32.mrb[14].mxu0  ;;  %v602_v47 = vadd.f32 %v1438_v44, %v2218_v62  ;;  %v1891_v43 = vmov 0.0   ;;  %v1892_v44 = vmov 0  }
 0x123   : > { %v1440_v48 = vpop.f32.mrb[15].mxu0  ;;  %1637 = vmatprep.mubr.msk.f32.mxu0 %vm1890_vm5, %v1891_v43  ;;  %1785 = vset.pattern.permute.xlu0 %v1892_v44 }
 0x124   : > { %v1441_v49 = vadd.f32 %v1440_v48, %v1439_v46  ;;  %v747_v50 = vadd.f32 %v746_v1, %v602_v47  ;;  %1588 = vmatmul.mubr.msk.f32.gmra.mrb[20].mxu1 %vm826_vm4, %v800_v45 }
 0x126   : > { %v607_v51 = vadd.f32 %v1441_v49, %v2218_v62  ;;  %v801_v52 = vmax.f32 %v747_v50, 0.0  ;;  %v1442_v53 = vpop.f32.mrb[16].mxu0 }
 0x127   : > { %v1443_v54 = vpop.f32.mrb[17].mxu0 }
 0x128   : > { %v752_v55 = vadd.f32 %v2220_v63, %v607_v51  ;;  %v1444_v56 = vadd.f32 %v1443_v54, %v1442_v53  ;;  %1590 = vmatprep.mubr.msk.f32.mxu1 %vm826_vm4, %v801_v52 }
 0x12a   : > { %v802_v57 = vmax.f32 %v752_v55, 0.0  ;;  %v1445_v58 = vpop.f32.mrb[18].mxu0  ;;  %v612_v59 = vadd.f32 %v1444_v56, %v2218_v62 }
 0x12b   : > { %v1446_v60 = vpop.f32.mrb[19].mxu0 }
 0x12c   : > { %v1447_v61 = vadd.f32 %v1446_v60, %v1445_v58  ;;  %v757_v0 = vadd.f32 %v756_v8, %v612_v59  ;;  %1591 = vmatmul.mubr.msk.f32.gmra.mrb[22].mxu1 %vm826_vm4, %v802_v57 }
 0x12e   : > { %v617_v1 = vadd.f32 %v1447_v61, %v2218_v62  ;;  %v803_v2 = vmax.f32 %v757_v0, 0.0  ;;  %v1448_v3 = vpop.f32.mrb[20].mxu0 }
 0x12f   : > { %v1449_v4 = vpop.f32.mrb[21].mxu0 }
 0x130   : > { %v762_v6 = vadd.f32 %v2223_v5, %v617_v1  ;;  %v1450_v63 = vadd.f32 %v1449_v4, %v1448_v3  ;;  %1593 = vmatprep.mubr.msk.f32.mxu1 %vm826_vm4, %v803_v2 }
 0x132   : > { %v804_v7 = vmax.f32 %v762_v6, 0.0  ;;  %v1451_v9 = vpop.f32.mrb[22].mxu0  ;;  %v622_v10 = vadd.f32 %v1450_v63, %v2218_v62 }
 0x133   : > { %v1452_v11 = vpop.f32.mrb[23].mxu0 }
 0x134   : > { %v1453_v12 = vadd.f32 %v1452_v11, %v1451_v9  ;;  %v767_v8 = vadd.f32 %v2229_v16, %v622_v10  ;;  %1594 = vmatmul.mubr.msk.f32.gmra.mrb[24].mxu1 %vm826_vm4, %v804_v7 }
 0x136   : > { %v627_v14 = vadd.f32 %v1453_v12, %v2218_v62  ;;  %v805_v15 = vmax.f32 %v767_v8, 0.0  ;;  %v1454_v17 = vpop.f32.mrb[24].mxu0 }
 0x137   : > { %v1455_v18 = vpop.f32.mrb[25].mxu0 }
 0x138   : > { %v772_v5 = vadd.f32 %v2226_v13, %v627_v14  ;;  %v1456_v19 = vadd.f32 %v1455_v18, %v1454_v17  ;;  %1596 = vmatprep.mubr.msk.f32.mxu1 %vm826_vm4, %v805_v15 }
 0x13a   : > { %v806_v20 = vmax.f32 %v772_v5, 0.0  ;;  %v1457_v22 = vpop.f32.mrb[26].mxu0  ;;  %v632_v23 = vadd.f32 %v1456_v19, %v2218_v62 }
 0x13b   : > { %v1458_v25 = vpop.f32.mrb[27].mxu0 }
 0x13c   : > { %v1459_v26 = vadd.f32 %v1458_v25, %v1457_v22  ;;  %v777_v16 = vadd.f32 %v2235_v24, %v632_v23  ;;  %1597 = vmatmul.mubr.msk.f32.gmra.mrb[26].mxu1 %vm826_vm4, %v806_v20 }
 0x13e   : > { %v637_v27 = vadd.f32 %v1459_v26, %v2218_v62  ;;  %v807_v28 = vmax.f32 %v777_v16, 0.0  ;;  %v1460_v30 = vpop.f32.mrb[28].mxu0 }
 0x13f   : > { %v1461_v31 = vpop.f32.mrb[29].mxu0 }
 0x140   : > { %v782_v13 = vadd.f32 %v2232_v21, %v637_v27  ;;  %v1462_v33 = vadd.f32 %v1461_v31, %v1460_v30  ;;  %1599 = vmatprep.mubr.msk.f32.mxu1 %vm826_vm4, %v807_v28 }
 0x142   : > { %v808_v34 = vmax.f32 %v782_v13, 0.0  ;;  %v1463_v35 = vpop.f32.mrb[30].mxu0  ;;  %v642_v36 = vadd.f32 %v1462_v33, %v2218_v62 }
 0x143   : > { %v1464_v37 = vpop.f32.mrb[31].mxu0 }
 0x144   : > { %v1465_v38 = vadd.f32 %v1464_v37, %v1463_v35  ;;  %v787_v24 = vadd.f32 %v2241_v32, %v642_v36  ;;  %1600 = vmatmul.mubr.msk.f32.gmra.mrb[28].mxu1 %vm826_vm4, %v808_v34  ;;  %v1037_v32 = vld [vmem:[%s2436_s7] sm:$0x3] }
 0x145   : > { %1040 = vperm.xlu0 %1785, %v1037_v32  }
 0x146   : > { %v647_v39 = vadd.f32 %v1465_v38, %v2218_v62  ;;  %v809_v40 = vmax.f32 %v787_v24, 0.0  ;;  %v2283_v62 = vld [vmem:[%s2434_s5] ss:$0 sm:$0xff] }
 0x148   : > { %v792_v41 = vadd.f32 %v2238_v29, %v647_v39  ;;  %1602 = vmatprep.mubr.msk.f32.mxu1 %vm826_vm4, %v809_v40 }
 0x14a   : > { %v810_v21 = vmax.f32 %v792_v41, 0.0  ;;  %v1036_v41 = vld [vmem:[%s2435_s6] sm:$0x3] }
 0x14c   : > { %1603 = vmatmul.mubr.msk.f32.gmra.mrb[30].mxu1 %vm826_vm4, %v810_v21 }
 0x1c4   : > { %v1041_v21 = vpop.permute.xlu0 %1040 }
 0x1e7   : > { %v1583_v29 = vpop.f32.mrb[16].mxu1 }
 0x1e8   : > { %v947_v45 = vadd.f32 %v1583_v29, %v2283_v62  ;;  %v941_v46 = vpop.f32.mrb[17].mxu1  ;;  %v1893_v29 = vmov 1966171168  }
 0x1e9   : > { %v942_v47 = vadd.f32 %v2283_v62, %v941_v46  ;;  %v1173_v46 = vlaneseq }
 0x1ea   : > { %v1021_v48 = vmax.f32 %v947_v45, 0.0  ;;  %v1171_v45 = vunpack.c.l.s4 %v1893_v29 }
 0x1eb   : > { %v1020_v49 = vmax.f32 %v942_v47, 0.0 }
 0x1ec   : > { %v1172_v47 = vunpack.c.0.s8 %v1171_v45 }
 0x1ed   : > { %v1703_v51 = vpack.c.bf16 %v1021_v48, %v1020_v49  ;;  %v1174_v48 = vshrl.u32 %v1173_v46, 7 }
 0x1ef   : > { %v1586_v52 = vpop.f32.mrb[18].mxu1  ;;  %1705 = vmatpush3.bf16.xpose.msk.msra.mxu0 %vm2289_vm6, %v1703_v51  ;;  %v1175_v49 = vsub.s32 %v1172_v47, %v1174_v48 }
 0x1f0   : > { %v957_v53 = vadd.f32 %v1586_v52, %v2283_v62  ;;  %v951_v54 = vpop.f32.mrb[19].mxu1  ;;  %1706 = vmatprep.subr.bf16.mxu0 %v1889_v42  ;;  %v1164_v52 = vld [vmem:[%s351_s28] sm:$0x1] }
 0x1f1   : > { %v952_v55 = vadd.f32 %v2283_v62, %v951_v54 }
 0x1f2   : > { %v1023_v56 = vmax.f32 %v957_v53, 0.0 }
 0x1f3   : > { %v1022_v57 = vmax.f32 %v952_v55, 0.0 }
 0x1f5   : > { %v1707_v58 = vpack.c.bf16 %v1023_v56, %v1022_v57 }
 0x1f7   : > { %v1589_v59 = vpop.f32.mrb[20].mxu1  ;;  %1709 = vmatpush3.bf16.xpose.msk.msra.mxu0 %vm2289_vm6, %v1707_v58 }
 0x1f8   : > { %v967_v60 = vadd.f32 %v1589_v59, %v2283_v62  ;;  %v961_v61 = vpop.f32.mrb[21].mxu1  ;;  %1710 = vmatprep.subr.bf16.mxu0 %v1889_v42 }
 0x1f9   : > { %v962_v0 = vadd.f32 %v2283_v62, %v961_v61 }
 0x1fa   : > { %v1025_v1 = vmax.f32 %v967_v60, 0.0 }
 0x1fb   : > { %v1024_v2 = vmax.f32 %v962_v0, 0.0 }
 0x1fd   : > { %v1711_v3 = vpack.c.bf16 %v1025_v1, %v1024_v2 }
 0x1ff   : > { %v1592_v4 = vpop.f32.mrb[22].mxu1  ;;  %1713 = vmatpush3.bf16.xpose.msk.msra.mxu0 %vm2289_vm6, %v1711_v3 }
 0x200   : > { %v977_v6 = vadd.f32 %v1592_v4, %v2283_v62  ;;  %v971_v63 = vpop.f32.mrb[23].mxu1  ;;  %1714 = vmatprep.subr.bf16.mxu0 %v1889_v42 }
 0x201   : > { %v972_v7 = vadd.f32 %v2283_v62, %v971_v63 }
 0x202   : > { %v1027_v9 = vmax.f32 %v977_v6, 0.0 }
 0x203   : > { %v1026_v10 = vmax.f32 %v972_v7, 0.0 }
 0x205   : > { %v1715_v11 = vpack.c.bf16 %v1027_v9, %v1026_v10 }
 0x207   : > { %v1595_v12 = vpop.f32.mrb[24].mxu1  ;;  %1717 = vmatpush3.bf16.xpose.msk.msra.mxu0 %vm2289_vm6, %v1715_v11 }
 0x208   : > { %v987_v8 = vadd.f32 %v1595_v12, %v2283_v62  ;;  %v981_v14 = vpop.f32.mrb[25].mxu1  ;;  %1718 = vmatprep.subr.bf16.mxu0 %v1889_v42 }
 0x209   : > { %v982_v15 = vadd.f32 %v2283_v62, %v981_v14 }
 0x20a   : > { %v1029_v17 = vmax.f32 %v987_v8, 0.0 }
 0x20b   : > { %v1028_v18 = vmax.f32 %v982_v15, 0.0 }
 0x20d   : > { %v1719_v5 = vpack.c.bf16 %v1029_v17, %v1028_v18 }
 0x20f   : > { %v1598_v19 = vpop.f32.mrb[26].mxu1  ;;  %1721 = vmatpush3.bf16.xpose.msk.msra.mxu0 %vm2289_vm6, %v1719_v5 }
 0x210   : > { %v997_v20 = vadd.f32 %v1598_v19, %v2283_v62  ;;  %v991_v22 = vpop.f32.mrb[27].mxu1  ;;  %1722 = vmatprep.subr.bf16.mxu0 %v1889_v42 }
 0x211   : > { %v992_v23 = vadd.f32 %v2283_v62, %v991_v22 }
 0x212   : > { %v1031_v25 = vmax.f32 %v997_v20, 0.0 }
 0x213   : > { %v1030_v26 = vmax.f32 %v992_v23, 0.0 }
 0x215   : > { %v1723_v16 = vpack.c.bf16 %v1031_v25, %v1030_v26 }
 0x217   : > { %v1601_v27 = vpop.f32.mrb[28].mxu1  ;;  %1725 = vmatpush3.bf16.xpose.msk.msra.mxu0 %vm2289_vm6, %v1723_v16 }
 0x218   : > { %v1007_v28 = vadd.f32 %v1601_v27, %v2283_v62  ;;  %v1001_v30 = vpop.f32.mrb[29].mxu1  ;;  %1726 = vmatprep.subr.bf16.mxu0 %v1889_v42 }
 0x219   : > { %v1002_v31 = vadd.f32 %v2283_v62, %v1001_v30 }
 0x21a   : > { %v1033_v13 = vmax.f32 %v1007_v28, 0.0 }
 0x21b   : > { %v1032_v33 = vmax.f32 %v1002_v31, 0.0 }
 0x21d   : > { %v1727_v34 = vpack.c.bf16 %v1033_v13, %v1032_v33 }
 0x21f   : > { %v1604_v35 = vpop.f32.mrb[30].mxu1  ;;  %1729 = vmatpush3.bf16.xpose.msk.msra.mxu0 %vm2289_vm6, %v1727_v34 }
 0x220   : > { %v1017_v36 = vadd.f32 %v1604_v35, %v2283_v62  ;;  %v1011_v37 = vpop.f32.mrb[31].mxu1  ;;  %1730 = vmatprep.subr.bf16.mxu0 %v1889_v42 }
 0x221   : > { %v1012_v38 = vadd.f32 %v2283_v62, %v1011_v37 }
 0x222   : > { %v1035_v24 = vmax.f32 %v1017_v36, 0.0 }
 0x223   : > { %v1034_v39 = vmax.f32 %v1012_v38, 0.0 }
 0x225   : > { %v1731_v40 = vpack.c.bf16 %v1035_v24, %v1034_v39 }
 0x227   : > { %1733 = vmatpush3.bf16.xpose.msk.msra.mxu0 %vm2289_vm6, %v1731_v40 }
 0x22e   : > { %1638 = vmatmul.mubr.msk.f32.vlgmr.msra.gmra.mrb[32].mxu0 %vm826_vm4, %v1036_v41 }
 0x301   : > { %v1160_v43 = vpop.f32.mrb[32].mxu0 }
 0x302   : > { %v2334_v32 = vadd.f32 %v1160_v43, %v1041_v21  ;;  %v1639_v42 = vpop.f32.mrb[33].mxu0 }
 0x304   : > { %v1166_v44 = vsub.f32 0.0, %v2334_v32  ;;  %v1165_v54 = vsub.f32 %v1164_v52, %v2334_v32 }
 0x306   : > { %v1167_v62 = vmul.f32 1.442695, %v1166_v44 }
 0x308   : > { %1786 = vpow2.f32 %v1167_v62 }
 0x312   : > { %v1787_v50 = vpop.eup %1786 }
 0x313   : > { %v1176_v51 = vrot.slane %v1787_v50, %v1175_v49 }
 0x315   : > { %v1177_v53 = vcombine.high %v1176_v51, %v1176_v51 }
 0x317   : > { %v1184_v55 = vrot.slane %v1177_v53, %v1175_v49 }
 0x319   : > { %v1186_v56 = vmul.f32 %v1184_v55, %v1165_v54 }
 0x31b   : > { %1788 = vtanh.f32 %v1186_v56 }
 0x325   : > { %v1789_v57 = vpop.eup %1788 }
 0x326   : > { %v1189_v58 = vmul.f32 %v1789_v57, %v1789_v57  ;;  %1188 = vst [vmem:[%s342_s29] sm:$0x1] %v1789_v57 }
 0x327   : > { %1805 = shalt.err (!%p1802_p4)
}
 0x328   : > { %s1806_s26 = scalar_lea.hbm %s2353_s13, 16  ;;  %s1810_s17 = scalar_lea.hbm %s2437_s8, 32 }
 0x329   : > { %p1807_p7 = scmp.ne.s32.totalorder %s2353_s13, %s1806_s26  ;;  %p1811_p10 = scmp.lt.u32.totalorder %s2353_s13, %s2437_s8 }
 0x32a   : > { %p1812_p11 = scmp.lt.u32.totalorder %s1810_s17, %s1806_s26  ;;  %p1814_p13 = scmp.lt.u32.totalorder %s1806_s26, %s2353_s13 }
 0x32b   : > { %p1808_p8 = pnand %p1807_p7, %p1984_p5 }
 0x32c   : > { %p1813_p12 = por %p1812_p11, %p1811_p10 }
 0x32d   : > { %p1809_p9 = pneg %p1808_p8 }
 0x32e   : > { %p1815_p0 = por %p1814_p13, %p1813_p12 }
 0x330   : > { %p1816_p1 = pnand %p1815_p0, %p1809_p9 }
 0x332   : > { %1819 = shalt.err (!%p1816_p1)
}
 0x333   : > { %1735 = dma.vmem_to_hbm [thread:$0]  (%p1984_p5), %s2355_s14, 16, %s2353_s13, %s1203_s16   ;;  %v1190_v59 = vsub.f32 1.0, %v1189_v58  ;;  %v1197_v61 = vsub.s32 0, %v1174_v48 }
 0x334   : > { %s348_s22 = scalar_lea.vmem [#allocation4], %s2346_s18  ;;  %s2386_s28 = scalar_lea.hbm %s2438_s9, %s2004_s27 }
 0x335   : > { %v1191_v60 = vadd.f32 1e-06, %v1190_v59  ;;  %s1232_s25 = sshll.u32 %s348_s22, 4  ;;  %s1207_s14 = scalar_lea.sflag [#allocation5], %s2346_s18  ;;  %s2388_s25 = int_to_ptr.vmem [resolvable:$true] %s1232_s25 }
 0x336   : > { %s1820_s13 = scalar_lea.vmem %s2388_s25, 16  ;;  %s1895_s16 = smov [#allocation4]  }
 0x337   : > { %1790 = vlog2.f32 %v1191_v60  ;;  %p1821_p2 = scmp.ne.s32.totalorder %s2388_s25, %s1820_s13  ;;  %s1824_s29 = sshll.u32 %s1895_s16, 4  ;;  %s1825_s29 = int_to_ptr.vmem [resolvable:$false] %s1824_s29 }
 0x338   : > { %s1826_s17 = scalar_lea.vmem %s1825_s29, 32  ;;  %p1827_p7 = scmp.lt.s32.totalorder %s2388_s25, %s1825_s29 }
 0x339   : > { %p1822_p3 = pnand %p1821_p2, %p1984_p5  ;;  %p1828_p8 = scmp.lt.s32.totalorder %s1826_s17, %s1820_s13 }
 0x33b   : > { %p1823_p4 = pneg %p1822_p3  ;;  %p1829_p9 = por %p1828_p8, %p1827_p7 }
 0x33d   : > { %p1830_p10 = pnand %p1829_p9, %p1823_p4 }
 0x341   : > { %v1791_v0 = vpop.eup %1790 }
 0x342   : > { %v1193_v1 = vmul.f32 0.6931472, %v1791_v0 }
 0x344   : > { %v1198_v2 = vrot.slane %v1193_v1, %v1197_v61 }
 0x346   : > { %v1200_v3 = vadd.f32 %v1198_v2, %v1166_v44 }
 0x348   : > { %1201 = vst [vmem:[%s348_s22 - $0x1] sm:$0x2] %v1200_v3 }
 0x349   : > { %1833 = shalt.err (!%p1830_p10)
}
 0x34a   : > { %s1834_s27 = scalar_lea.hbm %s2386_s28, 16  ;;  %s1838_s23 = scalar_lea.hbm %s2438_s9, 32 }
 0x34b   : > { %p1835_p11 = scmp.ne.s32.totalorder %s2386_s28, %s1834_s27  ;;  %p1839_p0 = scmp.lt.u32.totalorder %s2386_s28, %s2438_s9 }
 0x34c   : > { %p1840_p1 = scmp.lt.u32.totalorder %s1838_s23, %s1834_s27  ;;  %p1842_p3 = scmp.lt.u32.totalorder %s1834_s27, %s2386_s28 }
 0x34d   : > { %p1836_p12 = pnand %p1835_p11, %p1984_p5 }
 0x34e   : > { %p1841_p2 = por %p1840_p1, %p1839_p0 }
 0x34f   : > { %p1837_p13 = pneg %p1836_p12 }
 0x350   : > { %p1843_p4 = por %p1842_p3, %p1841_p2 }
 0x352   : > { %p1844_p7 = pnand %p1843_p4, %p1837_p13 }
 0x354   : > { %1847 = shalt.err (!%p1844_p7)
}
 0x355   : > { %1736 = dma.vmem_to_hbm [thread:$0]  (%p1984_p5), %s2388_s25, 16, %s2386_s28, %s1207_s14  }
 0x356 PF: > { %p1746_p8 = scmp.ge.s32.totalorder %s1886_s12, 2  ;;  %s1244_s26 = sand.u32 1, %s1874_s30  }
 0x357   : > { %s1245_s13 = scalar_lea.sflag [#allocation3], %s1244_s26 }
 0x358   : > { %p1740_p9 = pnand %p1746_p8, %p1988_p6 }
 0x35a   : > { %1865 = dma.done.wait (!%p1740_p9), %s1245_s13, 16  }
 0x35b   : > { %1867 = vsyncadd (!%p1740_p9), %s1245_s13, 4294967280  ;;  %s1253_s16 = scalar_lea.sflag [#allocation5], %s1244_s26 }
 0x35c   : > { %1869 = dma.done.wait (!%p1740_p9), %s1253_s16, 16  }
 0x35d   : > { %1871 = vsyncadd (!%p1740_p9), %s1253_s16, 4294967280  ;;  %s2446_s19 = sld [smem:[#allocation8_spill]]  ;;  %p23_p5 = scmp.ge.s32.totalorder %s1971_s15, 4  }
 0x35e   : > { %s2447_s30 = smov %s1878_s10  ;;  %s2448_s10 = smov %s1882_s11 }
 0x35f   : > { %s2450_s12 = smov %s1971_s15  ;;  %25 = sbr.rel (!%p23_p5) target bundleno = 5 (0x5), region = 107 }
 0x363   : > { %s2449_s11 = smov %s2446_s19 }
 0x366   :  { %1257 = vsyncpa [#allocation3], 1 }
 0x367   :  { %1259 = vsyncpa [#allocation3 + $0x1], 1 }
 0x368   :  { %1260 = vsyncpa [#allocation5], 1 }
 0x369   :  { %1262 = vsyncpa [#allocation5 + $0x1], 1 }

</bundles_post_ra>
